<compile_context>
chip_gen: v7x
topology: tpu7x:2x2x1
jax: 0.10.0
libtpu: 0.0.40
codegen_flags: <defaults>
</compile_context>

<pallas_src>
import jax
import jax.numpy as jnp
from jax.experimental import pallas as pl
from jax.experimental.pallas import tpu as pltpu


def _round_up(x, m):
    return (x + m - 1) // m * m


def _vmem_capacity_bytes():
    try:
        return int(pltpu.get_tpu_info().vmem_capacity_bytes)
    except Exception:
        return 64 * 1024 * 1024  # conservative (v7x per-TC VMEM)


# ---------------------------------------------------------------------------
# Kernel
# ---------------------------------------------------------------------------
def regression_head_kernel(x_ref, w1_ref, b1_ref, w2_ref, b2_ref, o_ref, acc_ref):
    j = pl.program_id(1)  # hidden-out chunk index (reduction axis for out_proj)

    @pl.when(j == 0)
    def _():
        acc_ref[...] = jnp.zeros_like(acc_ref)

    # dense chunk: x @ W1[:, chunk]  (MXU, explicitly matched operand dtypes,
    # f32 accumulation), + b1[chunk] in f32.
    h = jnp.dot(x_ref[...].astype(w1_ref.dtype), w1_ref[...],
                preferred_element_type=jnp.float32)
    # tanh in the compute dtype: bf16 EUP on v6e/v7x when weights are bf16,
    # stays f32 for f32 weights (v5e path).
    h = jnp.tanh((h + b1_ref[...]).astype(w2_ref.dtype))

    # out_proj contribution of this hidden chunk, accumulated in f32.
    acc_ref[...] += jnp.dot(h, w2_ref[...], preferred_element_type=jnp.float32)

    @pl.when(j == pl.num_programs(1) - 1)
    def _():
        o_ref[...] = (acc_ref[...] + b2_ref[...]).astype(o_ref.dtype)


# ---------------------------------------------------------------------------
# One-time parameter preparation (hoisted out of the per-call path)
# ---------------------------------------------------------------------------
def prepare_regression_head_params(w1, b1, w2, b2, compute_dtype=None):
    """Pad (lane-align) and optionally cast the weights ONCE at model load.

    Weights are stored (in, out), i.e. PyTorch `linear.weight.T`.
    Padding is exact: zero W1 columns + zero b1 give tanh(0)=0, and zero W2
    rows/columns + zero b2 leave the sliced output unchanged.
    """
    hidden = w1.shape[0]
    num_labels = w2.shape[1]
    hp = _round_up(hidden, 128)
    npd = _round_up(num_labels, 128)
    wdt = compute_dtype if compute_dtype is not None else w1.dtype

    def pad2(a, rows, cols, dt):
        a = a.astype(dt)
        if a.shape == (rows, cols):
            return a
        return jnp.zeros((rows, cols), dt).at[:a.shape[0], :a.shape[1]].set(a)

    return dict(
        w1=pad2(w1, hp, hp, wdt),
        b1=pad2(b1.reshape(1, -1), 1, hp, jnp.float32),
        w2=pad2(w2, hp, npd, wdt),
        b2=pad2(b2.reshape(1, -1), 1, npd, jnp.float32),
        hidden=hidden,
        num_labels=num_labels,
    )


# ---------------------------------------------------------------------------
# Tiling heuristics
# ---------------------------------------------------------------------------
def _pick_tm(m, tm_max=512):
    tm = min(tm_max, max(8, _round_up(m, 8)))
    # >=2 grid steps so ("parallel",) actually engages both TensorCores (v7x).
    while tm > 8 and pl.cdiv(m, tm) < 2:
        tm = max(8, _round_up(tm // 2, 8))
    # Avoid paying for >25% ghost rows in the last tile.
    while tm > 8 and (_round_up(m, tm) - m) > tm // 4:
        tm = max(8, _round_up(tm // 2, 8))
    return tm


def _pick_tn(tm, hp, npd, x_bytes, w_bytes, out_bytes, budget):
    """Largest hidden-out chunk whose VMEM footprint fits the budget."""
    def need(tn):
        n_k = hp // tn
        wbuf = 1 if n_k == 1 else 2           # resident weights -> single buffer
        b = 2 * tm * hp * x_bytes             # x tile (double-buffered)
        b += wbuf * (hp * tn + tn * npd) * w_bytes   # W1 / W2 chunks
        b += wbuf * tn * 4 + npd * 4          # b1 / b2 (f32)
        b += 2 * tm * npd * out_bytes         # out tile (double-buffered)
        b += tm * npd * 4                     # f32 accumulator scratch
        b += tm * tn * (4 + w_bytes)          # f32 h intermediate + cast copy
        return b

    candidates = [c for c in range(hp, 127, -128) if hp % c == 0]
    for tn in candidates:
        if need(tn) <= budget:
            return tn, need(tn)
    tn = candidates[-1]
    return tn, need(tn)


# ---------------------------------------------------------------------------
# Wrapper
# ---------------------------------------------------------------------------
def regression_head(features, params, *, tm_max=512):
    """features: (..., hidden) -> (..., num_labels). Eval mode (dropout = identity)."""
    hidden = params["hidden"]
    num_labels = params["num_labels"]
    w1_p, b1_p, w2_p, b2_p = params["w1"], params["b1"], params["w2"], params["b2"]
    hp = w1_p.shape[0]
    npd = w2_p.shape[1]

    *lead, feat = features.shape
    assert feat == hidden
    x2d = features.reshape(-1, hidden)
    m = x2d.shape[0]
    dt = features.dtype

    tm = _pick_tm(m, tm_max)
    m_pad = _round_up(m, tm)

    # Skip the activation padding copy when it is a no-op (lane-aligned hidden,
    # tile-aligned M) -- avoids a full extra HBM read+write of x per call.
    if m_pad == m and hp == hidden:
        x_p = x2d
    else:
        x_p = jnp.zeros((m_pad, hp), dt).at[:m, :hidden].set(x2d)

    cap = _vmem_capacity_bytes()
    budget = max(cap - 16 * 1024 * 1024, 16 * 1024 * 1024)
    tn, needed = _pick_tn(tm, hp, npd, dt.itemsize, w1_p.dtype.itemsize,
                          dt.itemsize, budget)
    n_k = hp // tn

    # Resident (constant index_map) weights gain nothing from double-buffering.
    w_mode = {"pipeline_mode": pl.Buffered(1)} if n_k == 1 else {}

    grid = (m_pad // tm, n_k)
    vmem_limit = int(min(max(needed + (8 << 20), 32 << 20), cap - (8 << 20)))

    out = pl.pallas_call(
        regression_head_kernel,
        out_shape=jax.ShapeDtypeStruct((m_pad, npd), dt),
        grid=grid,
        in_specs=[
            pl.BlockSpec((tm, hp), lambda i, j: (i, 0)),            # x tile (resident over j)
            pl.BlockSpec((hp, tn), lambda i, j: (0, j), **w_mode),  # W1 chunk
            pl.BlockSpec((1, tn), lambda i, j: (0, j), **w_mode),   # b1 chunk
            pl.BlockSpec((tn, npd), lambda i, j: (j, 0), **w_mode), # W2 chunk
            pl.BlockSpec((1, npd), lambda i, j: (0, 0),
                         pipeline_mode=pl.Buffered(1)),             # b2 (always resident)
        ],
        out_specs=pl.BlockSpec((tm, npd), lambda i, j: (i, 0)),
        scratch_shapes=[pltpu.VMEM((tm, npd), jnp.float32)],
        compiler_params=pltpu.CompilerParams(
            dimension_semantics=("parallel", "arbitrary"),
            vmem_limit_bytes=vmem_limit,
        ),
    )(x_p, w1_p, b1_p, w2_p, b2_p)

    return out[:m, :num_labels].reshape(*lead, num_labels)


# ---------------------------------------------------------------------------
if __name__ == "__main__":
    # Small shapes consistent with the module: batch=2, seq=8, hidden=32, num_labels=4
    batch, seq, hidden, num_labels = 2, 8, 32, 4

    key = jax.random.PRNGKey(0)
    k_x, k_w1, k_b1, k_w2, k_b2 = jax.random.split(key, 5)

    features = jax.random.normal(k_x, (batch, seq, hidden), dtype=jnp.float32)

    # nn.Linear(hidden, hidden) / nn.Linear(hidden, num_labels), stored (in, out) = W_pt.T
    w1 = jax.random.normal(k_w1, (hidden, hidden), dtype=jnp.float32) * 0.05
    b1 = jax.random.normal(k_b1, (hidden,), dtype=jnp.float32) * 0.05
    w2 = jax.random.normal(k_w2, (hidden, num_labels), dtype=jnp.float32) * 0.05
    b2 = jax.random.normal(k_b2, (num_labels,), dtype=jnp.float32) * 0.05

    # Reference in plain JAX (dropout is identity in eval mode)
    ref = jnp.tanh(features @ w1 + b1) @ w2 + b2

    # f32 compute path (exact check)
    params = prepare_regression_head_params(w1, b1, w2, b2)
    out = jax.block_until_ready(regression_head(features, params))
    assert out.shape == (batch, seq, num_labels)
    assert jnp.allclose(out, ref, atol=1e-5, rtol=1e-5)

    # bf16 compute path (production setting for v6e/v7x) — looser check
    params_bf16 = prepare_regression_head_params(w1, b1, w2, b2,
                                                 compute_dtype=jnp.bfloat16)
    out_bf16 = jax.block_until_ready(regression_head(features, params_bf16))
    assert out_bf16.shape == (batch, seq, num_labels)
    assert jnp.allclose(out_bf16, ref, atol=5e-2, rtol=5e-2)

    print("KERNEL_OK")
</pallas_src>

<mosaic_0001>
module attributes {stable_mosaic.version = 11 : i64} {
  func.func @regression_head_kernel(%arg0: i32, %arg1: i32, %arg2: memref<8x128xf32, #tpu.memory_space<vmem>>, %arg3: memref<128x128xf32, #tpu.memory_space<vmem>>, %arg4: memref<1x128xf32, #tpu.memory_space<vmem>>, %arg5: memref<128x128xf32, #tpu.memory_space<vmem>>, %arg6: memref<1x128xf32, #tpu.memory_space<vmem>>, %arg7: memref<8x128xf32, #tpu.memory_space<vmem>>, %arg8: memref<8x128xf32, #tpu.memory_space<vmem>>) attributes {dimension_semantics = [#tpu.dimension_semantics<parallel>, #tpu.dimension_semantics<arbitrary>], iteration_bounds = array<i64: 2, 1>, scalar_prefetch = 0 : i64, scratch_operands = 1 : i64, tpu.core_type = #tpu.core_type<tc>, window_params = [{transform_indices = @transform_0, window_bounds = array<i64: 8, 128>}, {pipeline_mode = #tpu.pipeline_mode<synchronous>, transform_indices = @transform_1, window_bounds = array<i64: 128, 128>}, {pipeline_mode = #tpu.pipeline_mode<synchronous>, transform_indices = @transform_2, window_bounds = array<i64: 1, 128>}, {pipeline_mode = #tpu.pipeline_mode<synchronous>, transform_indices = @transform_3, window_bounds = array<i64: 128, 128>}, {pipeline_mode = #tpu.pipeline_mode<synchronous>, transform_indices = @transform_4, window_bounds = array<i64: 1, 128>}, {transform_indices = @transform_5, window_bounds = array<i64: 8, 128>}]} {
    %c0_i32 = arith.constant 0 : i32
    %0 = arith.cmpi eq, %arg1, %c0_i32 : i32
    %1 = arith.extui %0 : i1 to i32
    %c0_i32_0 = arith.constant 0 : i32
    %2 = arith.cmpi ne, %1, %c0_i32_0 : i32
    scf.if %2 {
      %cst_15 = arith.constant 0.000000e+00 : f32
      %18 = vector.broadcast %cst_15 : f32 to vector<8x128xf32>
      %c0_16 = arith.constant 0 : index
      %c0_17 = arith.constant 0 : index
      %19 = vector.load %arg8[%c0_16, %c0_17] : memref<8x128xf32, #tpu.memory_space<vmem>>, vector<8x128xf32>
      tpu.vector_store %arg8[%c0_16, %c0_17], %18 {strides = array<i32>} : memref<8x128xf32, #tpu.memory_space<vmem>>, vector<8x128xf32>,
    } else {
    }
    %c0 = arith.constant 0 : index
    %c0_1 = arith.constant 0 : index
    %3 = vector.load %arg2[%c0, %c0_1] : memref<8x128xf32, #tpu.memory_space<vmem>>, vector<8x128xf32>
    %c0_2 = arith.constant 0 : index
    %c0_3 = arith.constant 0 : index
    %4 = vector.load %arg3[%c0_2, %c0_3] : memref<128x128xf32, #tpu.memory_space<vmem>>, vector<128x128xf32>
    %cst = arith.constant dense<0.000000e+00> : vector<8x128xf32>
    %5 = tpu.matmul %3, %4, %cst {dimension_numbers = #tpu.dot_dimension_numbers<[1], [0], [0], [1], [0, 0, 1, 1], [], []>} : vector<8x128xf32>, vector<128x128xf32>, vector<8x128xf32> -> vector<8x128xf32>
    %c0_4 = arith.constant 0 : index
    %c0_5 = arith.constant 0 : index
    %6 = vector.load %arg4[%c0_4, %c0_5] : memref<1x128xf32, #tpu.memory_space<vmem>>, vector<1x128xf32>
    %7 = vector.broadcast %6 : vector<1x128xf32> to vector<8x128xf32>
    %8 = arith.addf %5, %7 : vector<8x128xf32>
    %9 = math.tanh %8 : vector<8x128xf32>
    %c0_6 = arith.constant 0 : index
    %c0_7 = arith.constant 0 : index
    %10 = vector.load %arg8[%c0_6, %c0_7] : memref<8x128xf32, #tpu.memory_space<vmem>>, vector<8x128xf32>
    %c0_8 = arith.constant 0 : index
    %c0_9 = arith.constant 0 : index
    %11 = vector.load %arg5[%c0_8, %c0_9] : memref<128x128xf32, #tpu.memory_space<vmem>>, vector<128x128xf32>
    %cst_10 = arith.constant dense<0.000000e+00> : vector<8x128xf32>
    %12 = tpu.matmul %9, %11, %cst_10 {dimension_numbers = #tpu.dot_dimension_numbers<[1], [0], [0], [1], [0, 0, 1, 1], [], []>} : vector<8x128xf32>, vector<128x128xf32>, vector<8x128xf32> -> vector<8x128xf32>
    %13 = arith.addf %10, %12 : vector<8x128xf32>
    %c0_11 = arith.constant 0 : index
    %c0_12 = arith.constant 0 : index
    %14 = vector.load %arg8[%c0_11, %c0_12] : memref<8x128xf32, #tpu.memory_space<vmem>>, vector<8x128xf32>
    tpu.vector_store %arg8[%c0_11, %c0_12], %13 {strides = array<i32>} : memref<8x128xf32, #tpu.memory_space<vmem>>, vector<8x128xf32>,
    %c0_i32_13 = arith.constant 0 : i32
    %15 = arith.cmpi eq, %arg1, %c0_i32_13 : i32
    %16 = arith.extui %15 : i1 to i32
    %c0_i32_14 = arith.constant 0 : i32
    %17 = arith.cmpi ne, %16, %c0_i32_14 : i32
    scf.if %17 {
      %c0_15 = arith.constant 0 : index
      %c0_16 = arith.constant 0 : index
      %18 = vector.load %arg8[%c0_15, %c0_16] : memref<8x128xf32, #tpu.memory_space<vmem>>, vector<8x128xf32>
      %c0_17 = arith.constant 0 : index
      %c0_18 = arith.constant 0 : index
      %19 = vector.load %arg6[%c0_17, %c0_18] : memref<1x128xf32, #tpu.memory_space<vmem>>, vector<1x128xf32>
      %20 = vector.broadcast %19 : vector<1x128xf32> to vector<8x128xf32>
      %21 = arith.addf %18, %20 : vector<8x128xf32>
      %c0_19 = arith.constant 0 : index
      %c0_20 = arith.constant 0 : index
      %22 = vector.load %arg7[%c0_19, %c0_20] : memref<8x128xf32, #tpu.memory_space<vmem>>, vector<8x128xf32>
      tpu.vector_store %arg7[%c0_19, %c0_20], %21 {strides = array<i32>} : memref<8x128xf32, #tpu.memory_space<vmem>>, vector<8x128xf32>,
    } else {
    }
    return
  }
  func.func @transform_0(%arg0: i32, %arg1: i32) -> (i32, i32) {
    %c0_i32 = arith.constant 0 : i32
    %c0_i32_0 = arith.constant 0 : i32
    return %arg0, %c0_i32 : i32, i32
  }
  func.func @transform_1(%arg0: i32, %arg1: i32) -> (i32, i32) {
    %c0_i32 = arith.constant 0 : i32
    %c0_i32_0 = arith.constant 0 : i32
    return %c0_i32, %arg1 : i32, i32
  }
  func.func @transform_2(%arg0: i32, %arg1: i32) -> (i32, i32) {
    %c0_i32 = arith.constant 0 : i32
    %c0_i32_0 = arith.constant 0 : i32
    return %c0_i32, %arg1 : i32, i32
  }
  func.func @transform_3(%arg0: i32, %arg1: i32) -> (i32, i32) {
    %c0_i32 = arith.constant 0 : i32
    %c0_i32_0 = arith.constant 0 : i32
    return %arg1, %c0_i32 : i32, i32
  }
  func.func @transform_4(%arg0: i32, %arg1: i32) -> (i32, i32) {
    %c0_i32 = arith.constant 0 : i32
    %c0_i32_0 = arith.constant 0 : i32
    %c0_i32_1 = arith.constant 0 : i32
    return %c0_i32, %c0_i32_0 : i32, i32
  }
  func.func @transform_5(%arg0: i32, %arg1: i32) -> (i32, i32) {
    %c0_i32 = arith.constant 0 : i32
    %c0_i32_0 = arith.constant 0 : i32
    return %arg0, %c0_i32 : i32, i32
  }
}

</mosaic_0001>

<bundles_post_ra>
// kernel: tpu_custom_call.1
= control target key start
LH: loop header
LB: loop body
LE: loop exit
PB: predicated region body
PF: predicated region fallthrough
CT: control target
= control target key end

     0   :  { %10 = vsyncpa [#allocation4], 0  ;;  %s1394_s0 = inlined_call_operand.hbm [shape: f32[16,128], index: 0, kind: input, shape index: {}]   ;;  %s1395_s1 = inlined_call_operand.hbm [shape: f32[128,128], index: 1, kind: input, shape index: {}]   ;;  %s1396_s2 = inlined_call_operand.vmem [shape: f32[1,128], index: 2, kind: input, shape index: {}]   ;;  %s1397_s3 = inlined_call_operand.hbm [shape: f32[128,128], index: 3, kind: input, shape index: {}]   ;;  %s1398_s4 = inlined_call_operand.vmem [shape: f32[1,128], index: 4, kind: input, shape index: {}]   ;;  %s1399_s5 = inlined_call_operand.hbm [shape: f32[16,128], index: 5, kind: output, shape index: {}]  }
   0x1   :  { %12 = vsyncpa [#allocation4 + $0x1], 0 }
   0x2   :  { %13 = vsyncpa [#allocation7], 0 }
   0x3   :  { %14 = vsyncpa [#allocation5], 0 }
   0x4   :  { %16 = vsyncpa [#allocation5 + $0x1], 0  ;;  %s1115_s18 = smov 0   ;;  %s1117_s19 = smov 0  }
   0x5   :  { %s1119_s20 = smov 0   ;;  %s1121_s21 = smov 0  }
   0x6   :  { %s1123_s22 = smov 0   ;;  %s1125_s23 = smov 0  }
   0x7 LB: > { %s640_s24 = sadd.s32 4294967295, %s1074_s23   ;;  %s641_s25 = sadd.s32 4294967294, %s1074_s23   ;;  %s1074_s23 = sphi %s1125_s23, %s22_s23   ;;  %s1070_s22 = sphi %s1123_s22, %s1421_s22   ;;  %s1066_s21 = sphi %s1121_s21, %s1420_s21   ;;  %s1062_s20 = sphi %s1119_s20, %s1419_s20   ;;  %s1058_s19 = sphi %s1117_s19, %s1418_s19   ;;  %s1054_s18 = sphi %s1115_s18, %s1417_s18  }
   0x8   : > { %p54_p0 = scmp.ne.s32.totalorder %s1058_s19, %s1054_s18  ;;  %p1149_p1 = scmp.eq.s32.totalorder %s640_s24, 0 }
   0x9   : > { %p1153_p2 = scmp.eq.s32.totalorder %s640_s24, 1  ;;  %p183_p3 = scmp.eq.s32.totalorder %s641_s25, 1 }
   0xa   : > { %s1404_s26 = scalar_select %p1149_p1, 1, 0 }
   0xb   : > { %p1159_p4 = por %p1149_p1, %p54_p0  ;;  %p642_p5 = scmp.ge.s32.totalorder %s1074_s23, 1 }
   0xc   : > { %p1164_p6 = por %p183_p3, %p54_p0  ;;  %p190_p7 = scmp.lt.s32.totalorder %s1074_s23, 3 }
   0xd   : > { %s1406_s28 = scalar_select %p1159_p4, 1, 0 }
   0xe   : > { %s1407_s29 = scalar_select %p1164_p6, 1, 0 }
   0xf   : > { %p1169_p8 = pnand %p642_p5, %p190_p7  ;;  %s1076_s6 = smov [#allocation6]  }
  0x10   : > { %s204_s7 = sshll.u32 %s1076_s6, 4  ;;  %s1077_s9 = smov [#allocation8]   ;;  %s1173_s7 = int_to_ptr.vmem [resolvable:$true] %s204_s7 }
  0x11   : > { %p824_p9 = pneg %p1169_p8  ;;  %s226_s10 = sshll.u32 %s1077_s9, 4  ;;  %s1184_s10 = int_to_ptr.vmem [resolvable:$true] %s226_s10 }
  0x12   : > { %s902_s13 = scalar_lea.hbm %s1395_s1, 2048 }
  0x13   : > { %p1180_p11 = pnand %p824_p9, %p1149_p1  ;;  %p903_p12 = scmp.ne.s32.totalorder %s1395_s1, %s902_s13 }
  0x14   : > { %p909_p5 = scmp.lt.u32.totalorder %s902_s13, %s1395_s1 }
  0x15   : > { %p904_p13 = pneg %p1180_p11 }
  0x17   : > { %p905_p0 = pnand %p904_p13, %p903_p12 }
  0x19   : > { %p906_p3 = pneg %p905_p0 }
  0x1b   : > { %p911_p7 = pnand %p909_p5, %p906_p3 }
  0x1d   : > { %914 = shalt.err (!%p911_p7)
}
  0x1e   : > { %s915_s24 = scalar_lea.vmem %s1173_s7, 2048  ;;  %p923_p1 = scmp.lt.s32.totalorder %s1173_s7, %s1173_s7 }
  0x1f   : > { %p916_p9 = scmp.ne.s32.totalorder %s1173_s7, %s915_s24  ;;  %p924_p12 = scmp.lt.s32.totalorder %s915_s24, %s915_s24 }
  0x21   : > { %p918_p10 = pnand %p916_p9, %p904_p13  ;;  %p925_p0 = por %p924_p12, %p923_p1 }
  0x23   : > { %p919_p6 = pneg %p918_p10 }
  0x25   : > { %p926_p4 = pnand %p925_p0, %p919_p6 }
  0x27   : > { %929 = shalt.err (!%p926_p4)
}
  0x28   : > { %s1078_s25 = smov 128   ;;  %s1079_s6 = smov 8  }
  0x29   : > { %827 = dma.hbm_to_vmem [thread:$0]  (!%p1180_p11), %s1395_s1, 2048, %s1173_s7, [#allocation7], %s1078_s25, %s1078_s25, %s1079_s6  }
  0x2a   : > { %s930_s14 = scalar_lea.hbm %s1397_s3, 2048 }
  0x2b   : > { %p931_p1 = scmp.ne.s32.totalorder %s1397_s3, %s930_s14  ;;  %p937_p10 = scmp.lt.u32.totalorder %s930_s14, %s1397_s3 }
  0x2d   : > { %p933_p4 = pnand %p931_p1, %p904_p13 }
  0x2f   : > { %p934_p6 = pneg %p933_p4 }
  0x31   : > { %p939_p3 = pnand %p937_p10, %p934_p6 }
  0x33   : > { %942 = shalt.err (!%p939_p3)
}
  0x34   : > { %s943_s7 = scalar_lea.vmem %s1184_s10, 2048  ;;  %p951_p12 = scmp.lt.s32.totalorder %s1184_s10, %s1184_s10 }
  0x35   : > { %p944_p5 = scmp.ne.s32.totalorder %s1184_s10, %s943_s7  ;;  %p952_p0 = scmp.lt.s32.totalorder %s943_s7, %s943_s7 }
  0x37   : > { %p946_p7 = pnand %p944_p5, %p904_p13  ;;  %p953_p1 = por %p952_p0, %p951_p12 }
  0x39   : > { %p947_p9 = pneg %p946_p7 }
  0x3b   : > { %p954_p4 = pnand %p953_p1, %p947_p9 }
  0x3d   : > { %957 = shalt.err (!%p954_p4)
}
  0x3e   : > { %830 = dma.hbm_to_vmem [thread:$0]  (!%p1180_p11), %s1397_s3, 2048, %s1184_s10, [#allocation7], %s1078_s25, %s1078_s25, %s1079_s6  }
  0x3f   : > { %s34_s12 = sadd.s32 1, %s1070_s22  ;;  %s41_s13 = sadd.s32 1, %s1062_s20 }
  0x40   : > { %p36_p13 = scmp.ge.s32.totalorder %s34_s12, 2  ;;  %p48_p6 = scmp.ne.s32.totalorder %s1062_s20, %s1058_s19 }
  0x41   : > { %p49_p10 = scmp.eq.s32.totalorder %s1074_s23, 0  ;;  %p841_p3 = scmp.lt.s32.totalorder %s1074_s23, 2 }
  0x42   : > { %s1423_s12 = smov (%p36_p13, %s34_s12), 0  ;;  %p1248_p7 = por %p1153_p2, %p48_p6 }
  0x43   : > { %p50_p5 = por %p49_p10, %p48_p6  ;;  %s38_s14 = ssub.s32 %s1070_s22, %s1423_s12 }
  0x44   : > { %s1410_s8 = scalar_select %p1248_p7, 1, 0 }
  0x45   : > { %s243_s15 = sand.u32 1, %s1062_s20   ;;  %p39_p9 = scmp.eq.s32.totalorder %s38_s14, 0 }
  0x46   : > { %s647_s10 = sshll.u32 %s243_s15, 3  ;;  %s648_s25 = sshll.u32 %s1070_s22, 7 }
  0x47   : > { %s1257_s6 = scalar_select %p39_p9, %s1062_s20, %s41_s13  }
  0x48   : > { %s1262_s24 = scalar_lea.hbm %s1394_s0, %s648_s25  ;;  %s247_s27 = scalar_lea.vmem [#allocation3], %s647_s10 }
  0x49   : > { %s254_s7 = sshll.u32 %s247_s27, 4  ;;  %p1266_p2 = pnand %p841_p3, %p50_p5  ;;  %s1270_s7 = int_to_ptr.vmem [resolvable:$true] %s254_s7 }
  0x4a   : > { %s244_s11 = scalar_lea.sflag [#allocation4], %s243_s15  ;;  %s958_s13 = scalar_lea.hbm %s1262_s24, 128 }
  0x4b   : > { %p959_p11 = scmp.ne.s32.totalorder %s1262_s24, %s958_s13  ;;  %p960_p12 = pneg %p1266_p2 }
  0x4c   : > { %s963_s25 = scalar_lea.hbm %s1394_s0, 256  ;;  %p964_p4 = scmp.lt.u32.totalorder %s1262_s24, %s1394_s0 }
  0x4d   : > { %p961_p0 = pnand %p960_p12, %p959_p11  ;;  %p965_p13 = scmp.lt.u32.totalorder %s963_s25, %s958_s13 }
  0x4e   : > { %p967_p10 = scmp.lt.u32.totalorder %s958_s13, %s1262_s24 }
  0x4f   : > { %p962_p1 = pneg %p961_p0  ;;  %p966_p6 = por %p965_p13, %p964_p4 }
  0x51   : > { %p968_p3 = por %p967_p10, %p966_p6 }
  0x53   : > { %p969_p5 = pnand %p968_p3, %p962_p1 }
  0x55   : > { %972 = shalt.err (!%p969_p5)
}
  0x56   : > { %s973_s15 = scalar_lea.vmem %s1270_s7, 128  ;;  %s1080_s27 = smov [#allocation3]  }
  0x57   : > { %p974_p9 = scmp.ne.s32.totalorder %s1270_s7, %s973_s15  ;;  %s978_s14 = sshll.u32 %s1080_s27, 4  ;;  %s979_s14 = int_to_ptr.vmem [resolvable:$false] %s978_s14 }
  0x58   : > { %s980_s10 = scalar_lea.vmem %s979_s14, 256  ;;  %p981_p7 = scmp.lt.s32.totalorder %s1270_s7, %s979_s14 }
  0x59   : > { %p976_p11 = pnand %p974_p9, %p960_p12  ;;  %p982_p4 = scmp.lt.s32.totalorder %s980_s10, %s973_s15 }
  0x5b   : > { %p977_p0 = pneg %p976_p11  ;;  %p983_p13 = por %p982_p4, %p981_p7 }
  0x5d   : > { %p984_p6 = pnand %p983_p13, %p977_p0 }
  0x5f   : > { %987 = shalt.err (!%p984_p6)
}
  0x60   : > { %834 = dma.hbm_to_vmem [thread:$0]  (!%p1266_p2), %s1262_s24, 128, %s1270_s7, %s244_s11  }
  0x61   : > { %263 = sbr.rel (%p1169_p8) target bundleno = 596 (0x254), region = 40  ;;  %s1300_s13 = sand.u32 (!%p1169_p8), 1, %s1058_s19  }
  0x62   : > { %s650_s25 = sshll.u32 (!%p1169_p8), %s1300_s13, 3  ;;  %s266_s16 = scalar_lea.sflag (!%p1169_p8), [#allocation4], %s1300_s13 }
  0x63   : > { %s1306_s17 = scalar_lea.vmem (!%p1169_p8), [#allocation3], %s650_s25  ;;  %p1412_p7 = scmp.ne.s32.totalorder (!%p1169_p8), %s1406_s28, 0 }
  0x68   : > { %1041 = dma.done.wait (%p1412_p7), %s266_s16, 128  }
  0x69   : > { %1043 = vsyncadd (%p1412_p7), %s266_s16, 4294967168  ;;  %p1413_p2 = scmp.ne.s32.totalorder %s1404_s26, 0 }
  0x6b   : > { %1045 = dma.done.wait (%p1413_p2), [#allocation7], 4096  }
  0x6c   : > { %1047 = vsyncadd (%p1413_p2), [#allocation7], 4294963200  ;;  %v1081_v0 = vmov 0.0|0.0   ;;  %vm1082_vm0 = vmmov 0   ;;  %v1083_v1 = vmov 0.0   ;;  %v317_v2 = vld [vmem:[#allocation6] sm:$0xff] }
  0x6d   : > { %764 = vmatprep.subr.bf16.mxu0 %v1081_v0  ;;  %726 = vmatprep.mubr.msk.f32.mxu0 %vm1082_vm0, %v1083_v1  ;;  %v318_v3 = vld [vmem:[#allocation6 + $0x8] sm:$0xff]  ;;  %v319_v4 = vld [vmem:[#allocation6 + $0x10] sm:$0xff]  ;;  %v320_v6 = vld [vmem:[#allocation6 + $0x18] sm:$0xff]  ;;  %s657_s7 = sshll.u32 %s1066_s21, 7  ;;  %s306_s9 = scalar_lea.vmem [#allocation9], %s650_s25 }
  0x6e   : > { %788 = vmatprep.subr.bf16.mxu1 %v1081_v0  ;;  %761 = vmatprep.mubr.msk.f32.mxu1 %vm1082_vm0, %v1083_v1  ;;  %v765_v5 = vpack.c.bf16 %v318_v3, %v317_v2  ;;  %v768_v7 = vpack.c.bf16 %v320_v6, %v319_v4  ;;  %v321_v8 = vld [vmem:[#allocation6 + $0x20] sm:$0xff]  ;;  %v322_v9 = vld [vmem:[#allocation6 + $0x28] sm:$0xff]  ;;  %v414_v12 = vld [vmem:[#allocation8 + $0x10] sm:$0xff]  ;;  %s527_s11 = sshll.u32 %s306_s9, 4  ;;  %s1345_s14 = scalar_lea.hbm %s1399_s5, %s657_s7  ;;  %s1347_s11 = int_to_ptr.vmem [resolvable:$true] %s527_s11 }
  0x6f   : > { %v412_v10 = vld [vmem:[#allocation8] sm:$0xff]  ;;  %v413_v11 = vld [vmem:[#allocation8 + $0x8] sm:$0xff]  ;;  %v415_v13 = vld [vmem:[#allocation8 + $0x18] sm:$0xff]  ;;  %v771_v14 = vpack.c.bf16 %v322_v9, %v321_v8  ;;  %s514_s10 = scalar_lea.sflag [#allocation5], %s1300_s13  ;;  %s988_s16 = scalar_lea.vmem %s1347_s11, 128 }
  0x70   : > { %766 = vmatpush3.bf16.msra.mxu0 %v765_v5  ;;  %v789_v15 = vpack.c.bf16 %v413_v11, %v412_v10  ;;  %v323_v16 = vld [vmem:[#allocation6 + $0x30] sm:$0xff]  ;;  %v324_v17 = vld [vmem:[#allocation6 + $0x38] sm:$0xff]  ;;  %v792_v18 = vpack.c.bf16 %v415_v13, %v414_v12  ;;  %v416_v19 = vld [vmem:[#allocation8 + $0x20] sm:$0xff]  ;;  %p989_p8 = scmp.ne.s32.totalorder %s1347_s11, %s988_s16  ;;  %p1414_p12 = scmp.ne.s32.totalorder %s1410_s8, 0 }
  0x71   : > { %767 = vmatprep.subr.bf16.mxu0 %v1081_v0  ;;  %v417_v20 = vld [vmem:[#allocation8 + $0x28] sm:$0xff]  ;;  %v774_v21 = vpack.c.bf16 %v324_v17, %v323_v16  ;;  %v325_v22 = vld [vmem:[#allocation6 + $0x40] sm:$0xff]  ;;  %v418_v25 = vld [vmem:[#allocation8 + $0x30] sm:$0xff]  ;;  %s1084_s21 = smov [#allocation9]  }
  0x72   : > { %790 = vmatpush3.bf16.msra.mxu1 %v789_v15  ;;  %v326_v23 = vld [vmem:[#allocation6 + $0x48] sm:$0xff]  ;;  %v795_v24 = vpack.c.bf16 %v417_v20, %v416_v19  ;;  %v419_v26 = vld [vmem:[#allocation8 + $0x38] sm:$0xff]  ;;  %v327_v28 = vld [vmem:[#allocation6 + $0x50] sm:$0xff]  ;;  %p990_p1 = pnand %p989_p8, %p1414_p12  ;;  %s992_s25 = sshll.u32 %s1084_s21, 4  ;;  %s993_s25 = int_to_ptr.vmem [resolvable:$false] %s992_s25 }
  0x73   : > { %791 = vmatprep.subr.bf16.mxu1 %v1081_v0  ;;  %v777_v27 = vpack.c.bf16 %v326_v23, %v325_v22  ;;  %v328_v29 = vld [vmem:[#allocation6 + $0x58] sm:$0xff]  ;;  %v798_v30 = vpack.c.bf16 %v419_v26, %v418_v25  ;;  %v420_v31 = vld [vmem:[#allocation8 + $0x40] sm:$0xff]  ;;  %v421_v32 = vld [vmem:[#allocation8 + $0x48] sm:$0xff]  ;;  %p995_p3 = scmp.lt.s32.totalorder %s1347_s11, %s993_s25 }
  0x74   : > { %769 = vmatpush3.bf16.msra.mxu0 %v768_v7  ;;  %v780_v33 = vpack.c.bf16 %v328_v29, %v327_v28  ;;  %v329_v34 = vld [vmem:[#allocation6 + $0x60] sm:$0xff]  ;;  %v330_v35 = vld [vmem:[#allocation6 + $0x68] sm:$0xff]  ;;  %v801_v36 = vpack.c.bf16 %v421_v32, %v420_v31  ;;  %v331_v38 = vld [vmem:[#allocation6 + $0x70] sm:$0xff]  ;;  %p991_p10 = pneg %p990_p1 }
  0x75   : > { %770 = vmatprep.subr.bf16.mxu0 %v1081_v0  ;;  %v783_v37 = vpack.c.bf16 %v330_v35, %v329_v34  ;;  %v332_v39 = vld [vmem:[#allocation6 + $0x78] sm:$0xff]  ;;  %v422_v42 = vld [vmem:[#allocation8 + $0x50] sm:$0xff]  ;;  %v424_v45 = vld [vmem:[#allocation8 + $0x60] sm:$0xff] }
  0x76   : > { %793 = vmatpush3.bf16.msra.mxu1 %v792_v18  ;;  %v786_v40 = vpack.c.bf16 %v332_v39, %v331_v38  ;;  %v316_v41 = vld [vmem:[%s1306_s17] sm:$0xff]  ;;  %v425_v46 = vld [vmem:[#allocation8 + $0x68] sm:$0xff]  ;;  %s994_s17 = scalar_lea.vmem %s993_s25, 256 }
  0x77   : > { %794 = vmatprep.subr.bf16.mxu1 %v1081_v0  ;;  %v423_v43 = vld [vmem:[#allocation8 + $0x58] sm:$0xff]  ;;  %v807_v47 = vpack.c.bf16 %v425_v46, %v424_v45  ;;  %v426_v48 = vld [vmem:[#allocation8 + $0x70] sm:$0xff]  ;;  %p996_p5 = scmp.lt.s32.totalorder %s994_s17, %s988_s16 }
  0x78   : > { %772 = vmatpush3.bf16.msra.mxu0 %v771_v14  ;;  %v804_v44 = vpack.c.bf16 %v423_v43, %v422_v42  ;;  %v427_v49 = vld [vmem:[#allocation8 + $0x78] sm:$0xff]  ;;  %v654_v51 = vld [vmem:[%s1396_s2] ss:$0 sm:$0xff] }
  0x79   : > { %773 = vmatprep.subr.bf16.mxu0 %v1081_v0  ;;  %v810_v50 = vpack.c.bf16 %v427_v49, %v426_v48  ;;  %v655_v56 = vld [vmem:[%s1398_s4] ss:$0 sm:$0xff]  ;;  %p997_p9 = por %p996_p5, %p995_p3 }
  0x7a   : > { %796 = vmatpush3.bf16.msra.mxu1 %v795_v24 }
  0x7b   : > { %797 = vmatprep.subr.bf16.mxu1 %v1081_v0  ;;  %p998_p11 = pnand %p997_p9, %p991_p10 }
  0x7c   : > { %775 = vmatpush3.bf16.msra.mxu0 %v774_v21 }
  0x7d   : > { %776 = vmatprep.subr.bf16.mxu0 %v1081_v0 }
  0x7e   : > { %799 = vmatpush3.bf16.msra.mxu1 %v798_v30 }
  0x7f   : > { %800 = vmatprep.subr.bf16.mxu1 %v1081_v0 }
  0x80   : > { %778 = vmatpush3.bf16.msra.mxu0 %v777_v27 }
  0x81   : > { %779 = vmatprep.subr.bf16.mxu0 %v1081_v0 }
  0x82   : > { %802 = vmatpush3.bf16.msra.mxu1 %v801_v36 }
  0x83   : > { %803 = vmatprep.subr.bf16.mxu1 %v1081_v0 }
  0x84   : > { %781 = vmatpush3.bf16.msra.mxu0 %v780_v33 }
  0x85   : > { %782 = vmatprep.subr.bf16.mxu0 %v1081_v0 }
  0x86   : > { %805 = vmatpush3.bf16.msra.mxu1 %v804_v44 }
  0x87   : > { %806 = vmatprep.subr.bf16.mxu1 %v1081_v0 }
  0x88   : > { %784 = vmatpush3.bf16.msra.mxu0 %v783_v37 }
  0x89   : > { %785 = vmatprep.subr.bf16.mxu0 %v1081_v0 }
  0x8a   : > { %808 = vmatpush3.bf16.msra.mxu1 %v807_v47 }
  0x8b   : > { %809 = vmatprep.subr.bf16.mxu1 %v1081_v0 }
  0x8c   : > { %787 = vmatpush3.bf16.msra.mxu0 %v786_v40 }
  0x8e   : > { %811 = vmatpush3.bf16.msra.mxu1 %v810_v50 }
  0x8f   : > { %727 = vmatmul.mubr.f32.vlgmr.msra.gmra.mrb[0].mxu0 %v316_v41 }
 0x162   : > { %v406_v52 = vpop.f32.mrb[0].mxu0 }
 0x163   : > { %v407_v53 = vadd.f32 %v654_v51, %v406_v52  ;;  %v728_v54 = vpop.f32.mrb[1].mxu0 }
 0x165   : > { %900 = vtanh.f32 %v407_v53 }
 0x16f   : > { %v901_v55 = vpop.eup %900 }
 0x170   : > { %762 = vmatmul.mubr.f32.vlgmr.msra.gmra.mrb[0].mxu1 %v901_v55 }
 0x243   : > { %v494_v57 = vpop.f32.mrb[0].mxu1 }
 0x244   : > { %v511_v58 = vadd.f32 %v655_v56, %v494_v57  ;;  %v763_v59 = vpop.f32.mrb[1].mxu1 }
 0x246   : > { %512 = vst [vmem:[%s306_s9] sm:$0xff] %v511_v58 }
 0x247   : > { %1001 = shalt.err (!%p998_p11)
}
 0x248   : > { %s1002_s13 = scalar_lea.hbm %s1345_s14, 128  ;;  %s1006_s30 = scalar_lea.hbm %s1399_s5, 256 }
 0x249   : > { %p1003_p0 = scmp.ne.s32.totalorder %s1345_s14, %s1002_s13  ;;  %p1007_p6 = scmp.lt.u32.totalorder %s1345_s14, %s1399_s5 }
 0x24a   : > { %p1008_p7 = scmp.lt.u32.totalorder %s1006_s30, %s1002_s13  ;;  %p1010_p8 = scmp.lt.u32.totalorder %s1002_s13, %s1345_s14 }
 0x24b   : > { %p1004_p4 = pnand %p1003_p0, %p1414_p12 }
 0x24c   : > { %p1009_p2 = por %p1008_p7, %p1007_p6 }
 0x24d   : > { %p1005_p13 = pneg %p1004_p4 }
 0x24e   : > { %p1011_p1 = por %p1010_p8, %p1009_p2 }
 0x250   : > { %p1012_p10 = pnand %p1011_p1, %p1005_p13 }
 0x252   : > { %1015 = shalt.err (!%p1012_p10)
}
 0x253   : > { %822 = dma.vmem_to_hbm [thread:$0]  (%p1414_p12), %s1347_s11, 128, %s1345_s14, %s514_s10  }
 0x254 PF: > { %s539_s9 = sand.u32 1, %s1054_s18   ;;  %p1415_p3 = scmp.ne.s32.totalorder %s1407_s29, 0 }
 0x255   : > { %p1416_p5 = scmp.ge.s32.totalorder %s1074_s23, 2  ;;  %s540_s15 = scalar_lea.sflag [#allocation5], %s539_s9 }
 0x257   : > { %p836_p9 = pnand %p1416_p5, %p1415_p3 }
 0x259   : > { %1049 = dma.done.wait (!%p836_p9), %s540_s15, 128  }
 0x25a   : > { %1051 = vsyncadd (!%p836_p9), %s540_s15, 4294967168  ;;  %s22_s23 = sadd.s32 1, %s1074_s23   ;;  %s1417_s18 = smov %s1058_s19 }
 0x25b   : > { %p19_p11 = scmp.ge.s32.totalorder %s22_s23, 4   ;;  %s1418_s19 = smov %s1062_s20 }
 0x25c   : > { %s1419_s20 = smov %s1257_s6  ;;  %s1420_s21 = smov %s1070_s22 }
 0x25d   : > { %s1421_s22 = smov %s1423_s12  ;;  %21 = sbr.rel (!%p19_p11) target bundleno = 7 (0x7), region = 106 }
 0x264   :  { %545 = vsyncpa [#allocation4], 1 }
 0x265   :  { %547 = vsyncpa [#allocation4 + $0x1], 1 }
 0x266   :  { %548 = vsyncpa [#allocation7], 1 }
 0x267   :  { %549 = vsyncpa [#allocation5], 1 }
 0x268   :  { %551 = vsyncpa [#allocation5 + $0x1], 1 }

</bundles_post_ra>
